<compile_context>
chip_gen: v7x
topology: tpu7x:2x2x1
jax: 0.10.0
libtpu: 0.0.40
codegen_flags: <defaults>
</compile_context>

<pallas_src>
import jax
import jax.numpy as jnp
from jax.experimental import pallas as pl
from jax.experimental.pallas import tpu as pltpu


def _round_up(x, m):
    return (x + m - 1) // m * m


# Conservative per-TC residency budget (fits v7x 64 MiB/TC with headroom,
# trivially fits v5e/v6e 128 MiB).
_VMEM_RESIDENT_BUDGET = 40 * 1024 * 1024


# ---------------------------------------------------------------------------
# Main path: VMEM-resident table, one-hot MXU gather, tile_b rows per step.
# ---------------------------------------------------------------------------
def _gather_tile_kernel(ids_ref, table_ref, out_ref):
    """One grid step: gather tile_b rows of the VMEM-resident table.

    ids_ref:   VMEM (tile_b, 1) int32 — ids for this output tile.
    table_ref: VMEM (nsamples_p, nx) — full table; block index is constant
               across the grid so it is DMA'd from HBM only once.
    out_ref:   VMEM (tile_b, nx) — output tile, written with one dense store.
    """
    tile_b = out_ref.shape[0]
    nsamples_p = table_ref.shape[0]

    # one_hot(ids) built on the VPU (lane iota + compare), gather done as a
    # single MXU matmul: (tile_b, nsamples_p) @ (nsamples_p, nx).
    col = jax.lax.broadcasted_iota(jnp.int32, (tile_b, nsamples_p), 1)
    onehot = (ids_ref[...] == col).astype(table_ref.dtype)
    out_ref[...] = jnp.dot(
        onehot, table_ref[...],
        preferred_element_type=jnp.float32,
        precision=jax.lax.Precision.HIGHEST,
    ).astype(out_ref.dtype)


# ---------------------------------------------------------------------------
# Fallback: HBM-resident table, data-dependent index_map row gather (P2).
# Used when the table does not fit the per-TC VMEM budget.
# ---------------------------------------------------------------------------
def _gather_row_kernel(ids_ref, row_ref, out_ref):
    del ids_ref  # only consumed by the index_maps (scalar prefetch)
    out_ref[...] = row_ref[...]


def _hbm_row_gather(start_state, ids, batch, nx, dtype):
    return pl.pallas_call(
        _gather_row_kernel,
        out_shape=jax.ShapeDtypeStruct((batch, nx), dtype),
        grid_spec=pltpu.PrefetchScalarGridSpec(
            num_scalar_prefetch=1,                 # ids -> SMEM
            grid=(batch,),
            in_specs=[
                # One (1, nx) row per step, row index taken from the ids.
                pl.BlockSpec((1, nx), lambda i, ids_ref: (ids_ref[i], 0)),
            ],
            out_specs=pl.BlockSpec((1, nx), lambda i, ids_ref: (i, 0)),
        ),
        compiler_params=pltpu.CompilerParams(
            dimension_semantics=("arbitrary",),
        ),
    )(ids, start_state)


def par_start_encoder_forward(start_state, ids, *, tile_b=256,
                              force_hbm_gather=False):
    """Pallas equivalent of `par_start_encoder.forward(ids)`: start_state[ids]."""
    nsamples, nx = start_state.shape
    dtype = start_state.dtype
    ids = jnp.asarray(ids, jnp.int32)
    (batch,) = ids.shape

    # PyTorch raises on out-of-range ids; here we clamp to keep index math safe.
    ids = jnp.clip(ids, 0, nsamples - 1)

    itemsize = jnp.dtype(dtype).itemsize
    sub_mult = 8 * max(1, 4 // itemsize)          # sublane tile: f32 8, bf16 16
    nsamples_p = _round_up(nsamples, sub_mult)

    # Rows per grid step: multiple of 8, large enough to amortize the
    # ~0.35 us/step overhead, and (for big batches) small enough that the grid
    # has >= 2 steps so v7x megacore can split the "parallel" axis.
    padded8 = _round_up(batch, 8)
    tb = _round_up(min(int(tile_b), padded8), 8)
    if tb >= padded8 and padded8 >= 16:
        tb = _round_up(padded8 // 2, 8)
    padded = _round_up(batch, tb)

    # Packed 2-D VMEM footprints; Pallas double-buffers every BlockSpec'd
    # operand (even with a constant block index), hence the factor 2.
    table_bytes = nsamples_p * _round_up(nx, 128) * itemsize
    out_tile_bytes = _round_up(tb, sub_mult) * _round_up(nx, 128) * itemsize
    ids_tile_bytes = _round_up(tb, 8) * 128 * 4
    vmem_needed = 2 * (table_bytes + out_tile_bytes + ids_tile_bytes)

    if force_hbm_gather or vmem_needed > _VMEM_RESIDENT_BUDGET:
        return _hbm_row_gather(start_state, ids, batch, nx, dtype)

    # --- VMEM-resident one-hot-matmul path -----------------------------------
    ids_p = ids if padded == batch else jnp.pad(ids, (0, padded - batch))
    ids2d = ids_p.reshape(padded, 1)
    table = start_state
    if nsamples_p != nsamples:
        table = jnp.pad(table, ((0, nsamples_p - nsamples), (0, 0)))

    vmem_limit = int(min(max(vmem_needed + (8 << 20), 16 << 20), 56 << 20))

    out = pl.pallas_call(
        _gather_tile_kernel,
        out_shape=jax.ShapeDtypeStruct((padded, nx), dtype),
        grid_spec=pltpu.PrefetchScalarGridSpec(
            num_scalar_prefetch=0,
            grid=(padded // tb,),
            in_specs=[
                pl.BlockSpec((tb, 1), lambda i: (i, 0)),           # ids tile
                pl.BlockSpec((nsamples_p, nx), lambda i: (0, 0)),  # resident table
            ],
            out_specs=pl.BlockSpec((tb, nx), lambda i: (i, 0)),
        ),
        compiler_params=pltpu.CompilerParams(
            dimension_semantics=("parallel",),   # distinct out tile per step
            vmem_limit_bytes=vmem_limit,
        ),
    )(ids2d, table)

    return out if padded == batch else out[:batch]


if __name__ == "__main__":
    key = jax.random.PRNGKey(0)
    k1, k2, k3, k4 = jax.random.split(key, 4)

    # Case 1: small shapes consistent with the module; single-tile batch.
    nx, nsamples, batch = 32, 16, 8
    start_state = 0.1 * jax.random.normal(k1, (nsamples, nx), dtype=jnp.float32)
    ids = jax.random.randint(k2, (batch,), 0, nsamples, dtype=jnp.int32)

    out = jax.block_until_ready(par_start_encoder_forward(start_state, ids))
    ref = start_state[ids]
    assert out.shape == (batch, nx), out.shape
    assert out.dtype == jnp.float32, out.dtype
    assert bool(jnp.allclose(out, ref, rtol=0.0, atol=1e-6)), "mismatch (case 1)"

    # Case 2: batch not a multiple of the tile -> padding + 2-step grid.
    nx2, nsamples2, batch2 = 32, 24, 20
    start_state2 = 0.1 * jax.random.normal(k3, (nsamples2, nx2), dtype=jnp.float32)
    ids2 = jax.random.randint(k4, (batch2,), 0, nsamples2, dtype=jnp.int32)

    out2 = jax.block_until_ready(par_start_encoder_forward(start_state2, ids2))
    ref2 = start_state2[ids2]
    assert out2.shape == (batch2, nx2), out2.shape
    assert bool(jnp.allclose(out2, ref2, rtol=0.0, atol=1e-6)), "mismatch (case 2)"

    # Case 3: exercise the HBM-resident (data-dependent index_map) fallback.
    out3 = jax.block_until_ready(
        par_start_encoder_forward(start_state2, ids2, force_hbm_gather=True))
    assert out3.shape == (batch2, nx2), out3.shape
    assert bool(jnp.array_equal(out3, ref2)), "mismatch (HBM fallback)"

    print("KERNEL_OK")
</pallas_src>

<mosaic_0001>
module attributes {stable_mosaic.version = 11 : i64} {
  func.func @_gather_tile_kernel(%arg0: i32, %arg1: memref<8x1xi32, #tpu.memory_space<vmem>>, %arg2: memref<16x32xf32, #tpu.memory_space<vmem>>, %arg3: memref<8x32xf32, #tpu.memory_space<vmem>>) attributes {dimension_semantics = [#tpu.dimension_semantics<parallel>], iteration_bounds = array<i64: 1>, scalar_prefetch = 0 : i64, scratch_operands = 0 : i64, tpu.core_type = #tpu.core_type<tc>, window_params = [{transform_indices = @transform_0, window_bounds = array<i64: 8, 1>}, {pipeline_mode = #tpu.pipeline_mode<synchronous>, transform_indices = @transform_1, window_bounds = array<i64: 16, 32>}, {transform_indices = @transform_2, window_bounds = array<i64: 8, 32>}]} {
    %0 = tpu.iota {dimensions = array<i32: 1>} : vector<8x16xi32>
    %c0 = arith.constant 0 : index
    %c0_0 = arith.constant 0 : index
    %1 = vector.load %arg1[%c0, %c0_0] : memref<8x1xi32, #tpu.memory_space<vmem>>, vector<8x1xi32>
    %2 = vector.broadcast %1 : vector<8x1xi32> to vector<8x16xi32>
    %3 = arith.cmpi eq, %2, %0 : vector<8x16xi32>
    %4 = arith.extui %3 : vector<8x16xi1> to vector<8x16xi32>
    %5 = arith.sitofp %4 : vector<8x16xi32> to vector<8x16xf32>
    %c0_1 = arith.constant 0 : index
    %c0_2 = arith.constant 0 : index
    %6 = vector.load %arg2[%c0_1, %c0_2] : memref<16x32xf32, #tpu.memory_space<vmem>>, vector<16x32xf32>
    %cst = arith.constant dense<0.000000e+00> : vector<8x32xf32>
    %7 = tpu.matmul %5, %6, %cst {dimension_numbers = #tpu.dot_dimension_numbers<[1], [0], [0], [1], [0, 0, 1, 1], [], []>, precision = #tpu.contract_precision<fp32>} : vector<8x16xf32>, vector<16x32xf32>, vector<8x32xf32> -> vector<8x32xf32>
    %c0_3 = arith.constant 0 : index
    %c0_4 = arith.constant 0 : index
    %8 = vector.load %arg3[%c0_3, %c0_4] : memref<8x32xf32, #tpu.memory_space<vmem>>, vector<8x32xf32>
    tpu.vector_store %arg3[%c0_3, %c0_4], %7 {strides = array<i32>} : memref<8x32xf32, #tpu.memory_space<vmem>>, vector<8x32xf32>,
    return
  }
  func.func @transform_0(%arg0: i32) -> (i32, i32) {
    %c0_i32 = arith.constant 0 : i32
    %c0_i32_0 = arith.constant 0 : i32
    return %arg0, %c0_i32 : i32, i32
  }
  func.func @transform_1(%arg0: i32) -> (i32, i32) {
    %c0_i32 = arith.constant 0 : i32
    %c0_i32_0 = arith.constant 0 : i32
    %c0_i32_1 = arith.constant 0 : i32
    return %c0_i32, %c0_i32_0 : i32, i32
  }
  func.func @transform_2(%arg0: i32) -> (i32, i32) {
    %c0_i32 = arith.constant 0 : i32
    %c0_i32_0 = arith.constant 0 : i32
    return %arg0, %c0_i32 : i32, i32
  }
}

</mosaic_0001>

<bundles_post_ra>
// kernel: tpu_custom_call.1
= control target key start
LH: loop header
LB: loop body
LE: loop exit
PB: predicated region body
PF: predicated region fallthrough
CT: control target
= control target key end

     0   :  { %7 = vsyncpa [#allocation3], 0  ;;  %s725_s0 = inlined_call_operand.vmem [shape: s32[8,1], index: 0, kind: input, shape index: {}]   ;;  %s726_s1 = inlined_call_operand.hbm [shape: f32[16,32], index: 1, kind: input, shape index: {}]   ;;  %s727_s2 = inlined_call_operand.hbm [shape: f32[8,32], index: 2, kind: output, shape index: {}]  }
   0x1   :  { %8 = vsyncpa [#allocation4], 0  ;;  %s665_s9 = smov [#allocation2]   ;;  %s617_s13 = scalar_lea.hbm %s726_s1, 256 }
   0x2   :  { %s16_s10 = sshll.u32 %s665_s9, 4  ;;  %p618_p0 = scmp.ne.s32.totalorder %s726_s1, %s617_s13  ;;  %s17_s10 = int_to_ptr.vmem [resolvable:$true] %s16_s10 }
   0x3   :  { %p621_p1 = scmp.lt.u32.totalorder %s617_s13, %s726_s1 }
   0x5   :  { %p623_p2 = pnand %p621_p1, %p618_p0 }
   0x7   :  { %626 = shalt.err (!%p623_p2)
}
   0x8   :  { %s627_s18 = scalar_lea.vmem %s17_s10, 256  ;;  %p632_p4 = scmp.lt.s32.totalorder %s17_s10, %s17_s10 }
   0x9   :  { %p628_p3 = scmp.ne.s32.totalorder %s17_s10, %s627_s18  ;;  %p633_p5 = scmp.lt.s32.totalorder %s627_s18, %s627_s18 }
   0xb   :  { %p634_p6 = por %p633_p5, %p632_p4 }
   0xd   :  { %p635_p7 = pnand %p634_p6, %p628_p3 }
   0xf   :  { %638 = shalt.err (!%p635_p7)
}
  0x10   :  { %s666_s19 = smov 128   ;;  %s667_s20 = smov 8  }
  0x11   :  { %22 = dma.hbm_to_vmem [thread:$0]  %s726_s1, 256, %s17_s10, [#allocation3], %s666_s19, %s666_s19, %s667_s20  }
  0x12   :  { %661 = dma.done.wait [#allocation3], 256  }
  0x13   :  { %662 = vsyncadd [#allocation3], 4294967040  ;;  %v668_v0 = vmov 0   ;;  %v28_v1 = vld [vmem:[%s725_s0] sm:$0xff]  ;;  %v36_v3 = vld [vmem:[#allocation2 + $0x8] sm:$0xff]  ;;  %v669_v7 = vmov 0.0|0.0   ;;  %v26_v20 = vlaneseq }
  0x14   :  { %616 = vset.pattern.permute.xlu0 %v668_v0  ;;  %v35_v2 = vld [vmem:[#allocation2] sm:$0xff]  ;;  %v45_v5 = vand.u32 4294901760, %v36_v3  ;;  %590 = vmatprep.subr.bf16.mxu0 %v669_v7  ;;  %vm670_vm0 = vmmov 0   ;;  %v671_v10 = vmov 0.0   ;;  %vm37_vm1 = vcmask 130048   ;;  %s672_s0 = smov [#allocation5]  }
  0x15   :  { %30 = vperm.xlu0 %616, %v28_v1   ;;  %v42_v4 = vand.u32 4294901760, %v35_v2  ;;  %581 = vmatprep.subr.bf16.mxu1 %v669_v7  ;;  %v27_v21 = vand.u32 127, %v26_v20  ;;  %s508_s1 = sshll.u32 %s672_s0, 4  ;;  %vm500_vm3 = vcmask 261120   ;;  %s509_s1 = int_to_ptr.vmem [resolvable:$true] %s508_s1 }
  0x16   :  { %v127_v9 = vsub.f32 %v36_v3, %v45_v5  ;;  %564 = vmatprep.mubr.msk.f32.mxu0 %vm670_vm0, %v671_v10  ;;  %543 = vmatprep.mubr.msk.f32.mxu1 %vm670_vm0, %v671_v10  ;;  %s639_s25 = scalar_lea.vmem %s509_s1, 128  ;;  %p644_p9 = scmp.lt.s32.totalorder %s509_s1, %s509_s1 }
  0x17   :  { %v582_v6 = vpack.c.bf16 %v45_v5, %v42_v4  ;;  %v120_v8 = vsub.f32 %v35_v2, %v42_v4  ;;  %p640_p8 = scmp.ne.s32.totalorder %s509_s1, %s639_s25  ;;  %p645_p10 = scmp.lt.s32.totalorder %s639_s25, %s639_s25 }
  0x18   :  { %v128_v12 = vand.u32 4294901760, %v127_v9 }
  0x19   :  { %592 = vmatpush3.bf16.msra.mxu0 %v582_v6  ;;  %583 = vmatpush3.bf16.msra.mxu1 %v582_v6  ;;  %v121_v11 = vand.u32 4294901760, %v120_v8  ;;  %v588_v19 = vpack.c.bf16 %v127_v9, %v120_v8  ;;  %p646_p11 = por %p645_p10, %p644_p9 }
  0x1a   :  { %584 = vmatprep.subr.bf16.mxu1 %v669_v7  ;;  %593 = vmatprep.subr.bf16.mxu0 %v669_v7  ;;  %v129_v14 = vsub.f32 %v127_v9, %v128_v12 }
  0x1b   :  { %v122_v13 = vsub.f32 %v120_v8, %v121_v11  ;;  %v594_v15 = vpack.c.bf16 %v128_v12, %v121_v11  ;;  %p647_p12 = pnand %p646_p11, %p640_p8 }
  0x1c   :  { %v130_v17 = vand.u32 4294901760, %v129_v14 }
  0x1d   :  { %v123_v16 = vand.u32 4294901760, %v122_v13 }
  0x1f   :  { %v585_v18 = vpack.c.bf16 %v130_v17, %v123_v16 }
  0x94   :  { %v31_v22 = vpop.permute.xlu0 %30 }
  0x95   :  { %vm32_vm2 = vcmp.eq.s32.totalorder %v31_v22, %v27_v21 }
  0x96   :  { %v517_v23 = vsel %vm32_vm2, 1.0, %v671_v10 }
  0x97   :  { %v39_v24 = vsel %vm37_vm1, %v517_v23, 0 }
  0x98   :  { %v109_v25 = vsub.f32 %v39_v24, %v39_v24 }
  0x9a   :  { %v110_v26 = vand.u32 4294901760, %v109_v25 }
  0x9c   :  { %565 = vmatmul.mubr.f32.vlgmr.msra.gmra.mrb[0].mxu0 %v110_v26  ;;  %v111_v27 = vsub.f32 %v109_v25, %v110_v26 }
  0x9d   :  { %595 = vmatpush3.bf16.msra.mxu0 %v594_v15  ;;  %571 = vmatprep.mubr.msk.f32.mxu0 %vm670_vm0, %v671_v10 }
  0x9e   :  { %v112_v28 = vand.u32 4294901760, %v111_v27  ;;  %596 = vmatprep.subr.bf16.mxu0 %v669_v7 }
  0xa0   :  { %544 = vmatmul.mubr.f32.vlgmr.msra.gmra.mrb[0].mxu1 %v112_v28 }
  0xa1   :  { %586 = vmatpush3.bf16.msra.mxu1 %v585_v18  ;;  %550 = vmatprep.mubr.msk.f32.mxu1 %vm670_vm0, %v671_v10 }
  0xa2   :  { %587 = vmatprep.subr.bf16.mxu1 %v669_v7 }
  0xa4   :  { %572 = vmatmul.mubr.msk.f32.vlgmr.msra.gmra.mrb[0].mxu0 %vm37_vm1, %v517_v23 }
  0xa5   :  { %598 = vmatpush3.bf16.msra.mxu0 %v582_v6  ;;  %578 = vmatprep.mubr.msk.f32.mxu0 %vm670_vm0, %v671_v10 }
  0xa8   :  { %551 = vmatmul.mubr.msk.f32.vlgmr.msra.gmra.mrb[0].mxu1 %vm37_vm1, %v517_v23 }
  0xa9   :  { %589 = vmatpush3.bf16.msra.mxu1 %v588_v19  ;;  %557 = vmatprep.mubr.msk.f32.mxu1 %vm670_vm0, %v671_v10 }
  0xac   :  { %579 = vmatmul.mubr.msk.f32.vlgmr.msra.gmra.mrb[0].mxu0 %vm37_vm1, %v517_v23 }
  0xb0   :  { %558 = vmatmul.mubr.f32.vlgmr.msra.gmra.mrb[0].mxu1 %v109_v25 }
 0x17f   :  { %v496_v29 = vpop.f32.mrb[0].mxu0 }
 0x180   :  { %v580_v30 = vpop.f32.mrb[1].mxu0 }
 0x183   :  { %v271_v31 = vpop.f32.mrb[0].mxu1 }
 0x184   :  { %v599_v32 = vadd.f32 %v496_v29, %v271_v31  ;;  %v559_v33 = vpop.f32.mrb[1].mxu1 }
 0x186   :  { %501 = vst.msk [vmem:[#allocation5] sm:$0xff] %vm500_vm3, %v599_v32 }
 0x187   :  { %650 = shalt.err (!%p647_p12)
}
 0x188   :  { %s651_s28 = scalar_lea.hbm %s727_s2, 128 }
 0x189   :  { %p652_p13 = scmp.ne.s32.totalorder %s727_s2, %s651_s28  ;;  %p655_p0 = scmp.lt.u32.totalorder %s651_s28, %s727_s2 }
 0x18b   :  { %p657_p1 = pnand %p655_p0, %p652_p13 }
 0x18d   :  { %660 = shalt.err (!%p657_p1)
}
 0x18e   :  { %511 = dma.vmem_to_hbm [thread:$0]  %s509_s1, 128, %s727_s2, [#allocation4]  }
 0x18f   :  { %663 = dma.done.wait [#allocation4], 128  }
 0x190   :  { %664 = vsyncadd [#allocation4], 4294967168 }
 0x191   :  { %515 = vsyncpa [#allocation3], 1 }
 0x192   :  { %516 = vsyncpa [#allocation4], 1 }

</bundles_post_ra>
